<compile_context>
chip_gen: v6e
topology: v6e:2x2x1
jax: 0.10.0
libtpu: 0.0.40
codegen_flags: <defaults>
</compile_context>

<pallas_src>
import math

import jax
import jax.numpy as jnp
from jax.experimental import pallas as pl
from jax.experimental.pallas import tpu as pltpu


def _round_up(n: int, m: int) -> int:
    return ((n + m - 1) // m) * m


def _pad_cast_2d(a, rows, cols, dtype):
    """Zero-pad a 2-D array to (rows, cols) and cast, fusing both into one copy.
    Returns `a` unchanged if no padding and no cast is needed."""
    r, c = a.shape
    if r == rows and c == cols:
        return a if a.dtype == dtype else a.astype(dtype)
    out = jnp.zeros((rows, cols), dtype)
    return out.at[:r, :c].set(a.astype(dtype))


def tied_ae_kernel(x_ref, wt_ref, w_ref, b1_ref, b2_ref, enc_ref, rec_ref):
    """One batch tile: enc = tanh(x @ W^T + b1); rec = enc @ W + b2 (tied W)."""
    # Encoder: bf16 MXU matmul with f32 accumulation (W^T resident in VMEM).
    pre = jnp.dot(x_ref[...], wt_ref[...], preferred_element_type=jnp.float32)
    enc = jnp.tanh(pre + b1_ref[...])            # f32 bias add (VPU) + tanh (EUP)
    enc_ref[...] = enc.astype(enc_ref.dtype)

    # Decoder (tied weight): enc @ W, W resident in VMEM.
    rec = jnp.dot(enc.astype(w_ref.dtype), w_ref[...],
                  preferred_element_type=jnp.float32) + b2_ref[...]
    rec_ref[...] = rec.astype(rec_ref.dtype)


def _vmem_limit_bytes() -> int:
    """Per-generation scoped-VMEM target (~72% of physical, clamped)."""
    try:
        cap = int(getattr(pltpu.get_tpu_info(), "vmem_capacity_bytes", 64 << 20))
    except Exception:
        cap = 64 << 20  # conservative default (v7x-sized)
    return max(16 << 20, min(int(cap * 0.72), 96 << 20))


def _choose_block_b(B: int, inp_p: int, out_p: int, vmem_limit: int) -> int:
    """Largest MXU/DMA-friendly batch tile that fits the VMEM budget."""
    # Resident (single-buffered): bf16 W + bf16 W^T + f32 biases + slack.
    resident = 2 * (2 * out_p * inp_p) + 4 * (out_p + inp_p) + (2 << 20)
    # Streamed per batch row: double-buffered bf16 x + f32 enc/rec tiles.
    stream = 2 * (2 * inp_p) + 2 * (4 * out_p) + 2 * (4 * inp_p)
    # In-kernel temporaries per row: f32 pre, f32 enc, bf16 enc, f32 rec.
    temps = (4 + 4 + 2) * out_p + 4 * inp_p
    per_row = int((stream + temps) * 1.4)        # ~40% headroom
    avail = vmem_limit - resident
    if avail < per_row * 8:
        # TODO(synk): for very large W, tile the encoder 'out' dimension on a
        # second ("arbitrary") grid axis with an f32 accumulator scratch.
        raise ValueError(
            f"TiedAutoEncoder weight ({out_p}x{inp_p}) does not fit resident in "
            f"VMEM (limit {vmem_limit} bytes); out-dim tiling not implemented.")
    tb = avail // per_row
    if tb >= 256:
        tb = min((tb // 256) * 256, 4096)        # MXU-friendly M tile
    elif tb >= 16:
        tb = (tb // 16) * 16                     # bf16 sublane packing
    else:
        tb = 8
    if B < 8:
        return B                                 # block == full batch dim
    return max(8, min(tb, (B // 8) * 8))


def _resident_spec(shape, single_buffer: bool) -> pl.BlockSpec:
    if single_buffer and hasattr(pl, "Buffered"):
        return pl.BlockSpec(shape, lambda i: (0, 0), pipeline_mode=pl.Buffered(1))
    return pl.BlockSpec(shape, lambda i: (0, 0))


def _build_call(B, inp_p, out_p, tb, vmem_limit, single_buffer_residents):
    return pl.pallas_call(
        tied_ae_kernel,
        out_shape=(
            jax.ShapeDtypeStruct((B, out_p), jnp.float32),
            jax.ShapeDtypeStruct((B, inp_p), jnp.float32),
        ),
        grid=(pl.cdiv(B, tb),),
        in_specs=[
            pl.BlockSpec((tb, inp_p), lambda i: (i, 0)),              # x: streamed
            _resident_spec((inp_p, out_p), single_buffer_residents),  # W^T resident
            _resident_spec((out_p, inp_p), single_buffer_residents),  # W   resident
            _resident_spec((1, out_p), single_buffer_residents),      # b1
            _resident_spec((1, inp_p), single_buffer_residents),      # b2
        ],
        out_specs=(
            pl.BlockSpec((tb, out_p), lambda i: (i, 0)),
            pl.BlockSpec((tb, inp_p), lambda i: (i, 0)),
        ),
        compiler_params=pltpu.CompilerParams(
            dimension_semantics=("parallel",),   # batch tiles are independent
            vmem_limit_bytes=vmem_limit,
        ),
    )


def tied_autoencoder(x, w, b1, b2, *, block_b=None):
    B, inp = x.shape
    out, inp_w = w.shape
    assert inp_w == inp, "weight must be (out, inp)"

    # Lane-dense feature dims (skip the pad copy when already aligned).
    inp_p = _round_up(inp, 128)
    out_p = _round_up(out, 128)

    vmem_limit = _vmem_limit_bytes()
    tb = block_b if block_b is not None else _choose_block_b(B, inp_p, out_p, vmem_limit)

    bf16, f32 = jnp.bfloat16, jnp.float32
    # bf16 at the boundary; cast fused into the (conditional) pad copies.
    x_p = _pad_cast_2d(x, B, inp_p, bf16)
    w_p = _pad_cast_2d(w, out_p, inp_p, bf16)
    wt_p = _pad_cast_2d(w.T, inp_p, out_p, bf16)
    b1_p = _pad_cast_2d(b1.reshape(1, -1), 1, out_p, f32)
    b2_p = _pad_cast_2d(b2.reshape(1, -1), 1, inp_p, f32)

    args = (x_p, wt_p, w_p, b1_p, b2_p)
    try:
        enc_p, rec_p = _build_call(B, inp_p, out_p, tb, vmem_limit, True)(*args)
    except Exception:
        # Fallback if this JAX build rejects Buffered(1) on resident operands.
        enc_p, rec_p = _build_call(B, inp_p, out_p, tb, vmem_limit, False)(*args)

    enc = enc_p if out_p == out else enc_p[:, :out]
    rec = rec_p if inp_p == inp else rec_p[:, :inp]
    return enc, rec


def init_params(key, inp, out):
    # Mirror PyTorch reset_parameters():
    #   kaiming_uniform_(W, a=sqrt(5)) -> U(-1/sqrt(fan_in), 1/sqrt(fan_in)), fan_in = inp
    #   bias1 ~ U(-1/sqrt(fan_in), 1/sqrt(fan_in))    fan_in  = inp
    #   bias2 ~ U(-1/sqrt(fan_out), 1/sqrt(fan_out))  fan_out = out
    kw, kb1, kb2 = jax.random.split(key, 3)
    bw = 1.0 / math.sqrt(inp)
    w = jax.random.uniform(kw, (out, inp), jnp.float32, -bw, bw)
    b1 = jax.random.uniform(kb1, (out,), jnp.float32, -bw, bw)
    bo = 1.0 / math.sqrt(out)
    b2 = jax.random.uniform(kb2, (inp,), jnp.float32, -bo, bo)
    return w, b1, b2


if __name__ == "__main__":
    key = jax.random.PRNGKey(0)
    kx, kp = jax.random.split(key)

    B, INP, OUT = 8, 32, 16
    x = jax.random.normal(kx, (B, INP), jnp.float32)
    w, b1, b2 = init_params(kp, INP, OUT)

    enc, rec = tied_autoencoder(x, w, b1, b2)
    jax.block_until_ready((enc, rec))

    # Reference in plain JAX (fp32). Kernel uses bf16 matmul inputs with f32
    # accumulation, so tolerances are loosened accordingly.
    enc_ref = jnp.tanh(x @ w.T + b1)
    rec_ref = enc_ref @ w + b2
    assert enc.shape == (B, OUT) and rec.shape == (B, INP)
    assert jnp.allclose(enc, enc_ref, atol=3e-2, rtol=3e-2)
    assert jnp.allclose(rec, rec_ref, atol=3e-2, rtol=3e-2)

    print("KERNEL_OK")
</pallas_src>

<mosaic_0001>
module attributes {stable_mosaic.version = 11 : i64} {
  func.func @tied_ae_kernel(%arg0: i32, %arg1: memref<8x128xbf16, #tpu.memory_space<vmem>>, %arg2: memref<128x128xbf16, #tpu.memory_space<vmem>>, %arg3: memref<128x128xbf16, #tpu.memory_space<vmem>>, %arg4: memref<1x128xf32, #tpu.memory_space<vmem>>, %arg5: memref<1x128xf32, #tpu.memory_space<vmem>>, %arg6: memref<8x128xf32, #tpu.memory_space<vmem>>, %arg7: memref<8x128xf32, #tpu.memory_space<vmem>>) attributes {dimension_semantics = [#tpu.dimension_semantics<parallel>], iteration_bounds = array<i64: 1>, scalar_prefetch = 0 : i64, scratch_operands = 0 : i64, tpu.core_type = #tpu.core_type<tc>, window_params = [{transform_indices = @transform_0, window_bounds = array<i64: 8, 128>}, {pipeline_mode = #tpu.pipeline_mode<synchronous>, transform_indices = @transform_1, window_bounds = array<i64: 128, 128>}, {pipeline_mode = #tpu.pipeline_mode<synchronous>, transform_indices = @transform_2, window_bounds = array<i64: 128, 128>}, {pipeline_mode = #tpu.pipeline_mode<synchronous>, transform_indices = @transform_3, window_bounds = array<i64: 1, 128>}, {pipeline_mode = #tpu.pipeline_mode<synchronous>, transform_indices = @transform_4, window_bounds = array<i64: 1, 128>}, {transform_indices = @transform_5, window_bounds = array<i64: 8, 128>}, {transform_indices = @transform_6, window_bounds = array<i64: 8, 128>}]} {
    %c0 = arith.constant 0 : index
    %c0_0 = arith.constant 0 : index
    %0 = vector.load %arg1[%c0, %c0_0] : memref<8x128xbf16, #tpu.memory_space<vmem>>, vector<8x128xbf16>
    %c0_1 = arith.constant 0 : index
    %c0_2 = arith.constant 0 : index
    %1 = vector.load %arg2[%c0_1, %c0_2] : memref<128x128xbf16, #tpu.memory_space<vmem>>, vector<128x128xbf16>
    %cst = arith.constant dense<0.000000e+00> : vector<8x128xf32>
    %2 = tpu.matmul %0, %1, %cst {dimension_numbers = #tpu.dot_dimension_numbers<[1], [0], [0], [1], [0, 0, 1, 1], [], []>} : vector<8x128xbf16>, vector<128x128xbf16>, vector<8x128xf32> -> vector<8x128xf32>
    %c0_3 = arith.constant 0 : index
    %c0_4 = arith.constant 0 : index
    %3 = vector.load %arg4[%c0_3, %c0_4] : memref<1x128xf32, #tpu.memory_space<vmem>>, vector<1x128xf32>
    %4 = vector.broadcast %3 : vector<1x128xf32> to vector<8x128xf32>
    %5 = arith.addf %2, %4 : vector<8x128xf32>
    %6 = math.tanh %5 : vector<8x128xf32>
    %c0_5 = arith.constant 0 : index
    %c0_6 = arith.constant 0 : index
    %7 = vector.load %arg6[%c0_5, %c0_6] : memref<8x128xf32, #tpu.memory_space<vmem>>, vector<8x128xf32>
    tpu.vector_store %arg6[%c0_5, %c0_6], %6 {strides = array<i32>} : memref<8x128xf32, #tpu.memory_space<vmem>>, vector<8x128xf32>,
    %8 = arith.truncf %6 : vector<8x128xf32> to vector<8x128xbf16>
    %c0_7 = arith.constant 0 : index
    %c0_8 = arith.constant 0 : index
    %9 = vector.load %arg3[%c0_7, %c0_8] : memref<128x128xbf16, #tpu.memory_space<vmem>>, vector<128x128xbf16>
    %cst_9 = arith.constant dense<0.000000e+00> : vector<8x128xf32>
    %10 = tpu.matmul %8, %9, %cst_9 {dimension_numbers = #tpu.dot_dimension_numbers<[1], [0], [0], [1], [0, 0, 1, 1], [], []>} : vector<8x128xbf16>, vector<128x128xbf16>, vector<8x128xf32> -> vector<8x128xf32>
    %c0_10 = arith.constant 0 : index
    %c0_11 = arith.constant 0 : index
    %11 = vector.load %arg5[%c0_10, %c0_11] : memref<1x128xf32, #tpu.memory_space<vmem>>, vector<1x128xf32>
    %12 = vector.broadcast %11 : vector<1x128xf32> to vector<8x128xf32>
    %13 = arith.addf %10, %12 : vector<8x128xf32>
    %c0_12 = arith.constant 0 : index
    %c0_13 = arith.constant 0 : index
    %14 = vector.load %arg7[%c0_12, %c0_13] : memref<8x128xf32, #tpu.memory_space<vmem>>, vector<8x128xf32>
    tpu.vector_store %arg7[%c0_12, %c0_13], %13 {strides = array<i32>} : memref<8x128xf32, #tpu.memory_space<vmem>>, vector<8x128xf32>,
    return
  }
  func.func @transform_0(%arg0: i32) -> (i32, i32) {
    %c0_i32 = arith.constant 0 : i32
    %c0_i32_0 = arith.constant 0 : i32
    return %arg0, %c0_i32 : i32, i32
  }
  func.func @transform_1(%arg0: i32) -> (i32, i32) {
    %c0_i32 = arith.constant 0 : i32
    %c0_i32_0 = arith.constant 0 : i32
    %c0_i32_1 = arith.constant 0 : i32
    return %c0_i32, %c0_i32_0 : i32, i32
  }
  func.func @transform_2(%arg0: i32) -> (i32, i32) {
    %c0_i32 = arith.constant 0 : i32
    %c0_i32_0 = arith.constant 0 : i32
    %c0_i32_1 = arith.constant 0 : i32
    return %c0_i32, %c0_i32_0 : i32, i32
  }
  func.func @transform_3(%arg0: i32) -> (i32, i32) {
    %c0_i32 = arith.constant 0 : i32
    %c0_i32_0 = arith.constant 0 : i32
    %c0_i32_1 = arith.constant 0 : i32
    return %c0_i32, %c0_i32_0 : i32, i32
  }
  func.func @transform_4(%arg0: i32) -> (i32, i32) {
    %c0_i32 = arith.constant 0 : i32
    %c0_i32_0 = arith.constant 0 : i32
    %c0_i32_1 = arith.constant 0 : i32
    return %c0_i32, %c0_i32_0 : i32, i32
  }
  func.func @transform_5(%arg0: i32) -> (i32, i32) {
    %c0_i32 = arith.constant 0 : i32
    %c0_i32_0 = arith.constant 0 : i32
    return %arg0, %c0_i32 : i32, i32
  }
  func.func @transform_6(%arg0: i32) -> (i32, i32) {
    %c0_i32 = arith.constant 0 : i32
    %c0_i32_0 = arith.constant 0 : i32
    return %arg0, %c0_i32 : i32, i32
  }
}

module attributes {stable_mosaic.version = 11 : i64} {
  func.func @tied_ae_kernel(%arg0: i32, %arg1: memref<8x128xbf16, #tpu.memory_space<vmem>>, %arg2: memref<128x128xbf16, #tpu.memory_space<vmem>>, %arg3: memref<128x128xbf16, #tpu.memory_space<vmem>>, %arg4: memref<1x128xf32, #tpu.memory_space<vmem>>, %arg5: memref<1x128xf32, #tpu.memory_space<vmem>>, %arg6: memref<8x128xf32, #tpu.memory_space<vmem>>, %arg7: memref<8x128xf32, #tpu.memory_space<vmem>>) attributes {dimension_semantics = [#tpu.dimension_semantics<parallel>], iteration_bounds = array<i64: 1>, scalar_prefetch = 0 : i64, scratch_operands = 0 : i64, tpu.core_type = #tpu.core_type<tc>, window_params = [{transform_indices = @transform_0, window_bounds = array<i64: 8, 128>}, {pipeline_mode = #tpu.pipeline_mode<synchronous>, transform_indices = @transform_1, window_bounds = array<i64: 128, 128>}, {pipeline_mode = #tpu.pipeline_mode<synchronous>, transform_indices = @transform_2, window_bounds = array<i64: 128, 128>}, {pipeline_mode = #tpu.pipeline_mode<synchronous>, transform_indices = @transform_3, window_bounds = array<i64: 1, 128>}, {pipeline_mode = #tpu.pipeline_mode<synchronous>, transform_indices = @transform_4, window_bounds = array<i64: 1, 128>}, {transform_indices = @transform_5, window_bounds = array<i64: 8, 128>}, {transform_indices = @transform_6, window_bounds = array<i64: 8, 128>}]} {
    %c0 = arith.constant 0 : index
    %c0_0 = arith.constant 0 : index
    %0 = vector.load %arg1[%c0, %c0_0] : memref<8x128xbf16, #tpu.memory_space<vmem>>, vector<8x128xbf16>
    %c0_1 = arith.constant 0 : index
    %c0_2 = arith.constant 0 : index
    %1 = vector.load %arg2[%c0_1, %c0_2] : memref<128x128xbf16, #tpu.memory_space<vmem>>, vector<128x128xbf16>
    %cst = arith.constant dense<0.000000e+00> : vector<8x128xf32>
    %2 = tpu.matmul %0, %1, %cst {dimension_numbers = #tpu.dot_dimension_numbers<[1], [0], [0], [1], [0, 0, 1, 1], [], []>} : vector<8x128xbf16>, vector<128x128xbf16>, vector<8x128xf32> -> vector<8x128xf32>
    %c0_3 = arith.constant 0 : index
    %c0_4 = arith.constant 0 : index
    %3 = vector.load %arg4[%c0_3, %c0_4] : memref<1x128xf32, #tpu.memory_space<vmem>>, vector<1x128xf32>
    %4 = vector.broadcast %3 : vector<1x128xf32> to vector<8x128xf32>
    %5 = arith.addf %2, %4 : vector<8x128xf32>
    %6 = math.tanh %5 : vector<8x128xf32>
    %c0_5 = arith.constant 0 : index
    %c0_6 = arith.constant 0 : index
    %7 = vector.load %arg6[%c0_5, %c0_6] : memref<8x128xf32, #tpu.memory_space<vmem>>, vector<8x128xf32>
    tpu.vector_store %arg6[%c0_5, %c0_6], %6 {strides = array<i32>} : memref<8x128xf32, #tpu.memory_space<vmem>>, vector<8x128xf32>,
    %8 = arith.truncf %6 : vector<8x128xf32> to vector<8x128xbf16>
    %c0_7 = arith.constant 0 : index
    %c0_8 = arith.constant 0 : index
    %9 = vector.load %arg3[%c0_7, %c0_8] : memref<128x128xbf16, #tpu.memory_space<vmem>>, vector<128x128xbf16>
    %cst_9 = arith.constant dense<0.000000e+00> : vector<8x128xf32>
    %10 = tpu.matmul %8, %9, %cst_9 {dimension_numbers = #tpu.dot_dimension_numbers<[1], [0], [0], [1], [0, 0, 1, 1], [], []>} : vector<8x128xbf16>, vector<128x128xbf16>, vector<8x128xf32> -> vector<8x128xf32>
    %c0_10 = arith.constant 0 : index
    %c0_11 = arith.constant 0 : index
    %11 = vector.load %arg5[%c0_10, %c0_11] : memref<1x128xf32, #tpu.memory_space<vmem>>, vector<1x128xf32>
    %12 = vector.broadcast %11 : vector<1x128xf32> to vector<8x128xf32>
    %13 = arith.addf %10, %12 : vector<8x128xf32>
    %c0_12 = arith.constant 0 : index
    %c0_13 = arith.constant 0 : index
    %14 = vector.load %arg7[%c0_12, %c0_13] : memref<8x128xf32, #tpu.memory_space<vmem>>, vector<8x128xf32>
    tpu.vector_store %arg7[%c0_12, %c0_13], %13 {strides = array<i32>} : memref<8x128xf32, #tpu.memory_space<vmem>>, vector<8x128xf32>,
    return
  }
  func.func @transform_0(%arg0: i32) -> (i32, i32) {
    %c0_i32 = arith.constant 0 : i32
    %c0_i32_0 = arith.constant 0 : i32
    return %arg0, %c0_i32 : i32, i32
  }
  func.func @transform_1(%arg0: i32) -> (i32, i32) {
    %c0_i32 = arith.constant 0 : i32
    %c0_i32_0 = arith.constant 0 : i32
    %c0_i32_1 = arith.constant 0 : i32
    return %c0_i32, %c0_i32_0 : i32, i32
  }
  func.func @transform_2(%arg0: i32) -> (i32, i32) {
    %c0_i32 = arith.constant 0 : i32
    %c0_i32_0 = arith.constant 0 : i32
    %c0_i32_1 = arith.constant 0 : i32
    return %c0_i32, %c0_i32_0 : i32, i32
  }
  func.func @transform_3(%arg0: i32) -> (i32, i32) {
    %c0_i32 = arith.constant 0 : i32
    %c0_i32_0 = arith.constant 0 : i32
    %c0_i32_1 = arith.constant 0 : i32
    return %c0_i32, %c0_i32_0 : i32, i32
  }
  func.func @transform_4(%arg0: i32) -> (i32, i32) {
    %c0_i32 = arith.constant 0 : i32
    %c0_i32_0 = arith.constant 0 : i32
    %c0_i32_1 = arith.constant 0 : i32
    return %c0_i32, %c0_i32_0 : i32, i32
  }
  func.func @transform_5(%arg0: i32) -> (i32, i32) {
    %c0_i32 = arith.constant 0 : i32
    %c0_i32_0 = arith.constant 0 : i32
    return %arg0, %c0_i32 : i32, i32
  }
  func.func @transform_6(%arg0: i32) -> (i32, i32) {
    %c0_i32 = arith.constant 0 : i32
    %c0_i32_0 = arith.constant 0 : i32
    return %arg0, %c0_i32 : i32, i32
  }
}

</mosaic_0001>

<bundles_post_ra>
// kernel: tpu_custom_call.1
= control target key start
LH: loop header
LB: loop body
LE: loop exit
PB: predicated region body
PF: predicated region fallthrough
CT: control target
= control target key end

     0   :  { %12 = vsyncpa [#allocation3], 0  ;;  %s597_s0 = inlined_call_operand.hbm [shape: bf16[8,128], index: 0, kind: input, shape index: {}]   ;;  %s598_s1 = inlined_call_operand.hbm [shape: bf16[128,128], index: 1, kind: input, shape index: {}]   ;;  %s599_s2 = inlined_call_operand.hbm [shape: bf16[128,128], index: 2, kind: input, shape index: {}]   ;;  %s600_s3 = inlined_call_operand.vmem [shape: f32[1,128], index: 3, kind: input, shape index: {}]   ;;  %s601_s4 = inlined_call_operand.vmem [shape: f32[1,128], index: 4, kind: input, shape index: {}]   ;;  %s602_s5 = inlined_call_operand.hbm [shape: f32[8,128], index: 5, kind: output, shape index: {0}]   ;;  %s603_s6 = inlined_call_operand.hbm [shape: f32[8,128], index: 6, kind: output, shape index: {1}]  }
   0x1   :  { %13 = vsyncpa [#allocation6], 0 }
   0x2   :  { %14 = vsyncpa [#allocation4], 0 }
   0x3   :  { %15 = vsyncpa [#allocation10], 0  ;;  %s532_s21 = smov [#allocation5]  }
   0x4   :  { %s31_s22 = sshll.u32 %s532_s21, 4  ;;  %s32_s22 = int_to_ptr.vmem [resolvable:$true] %s31_s22 }
   0x5   :  { %s432_s23 = scalar_lea.vmem %s32_s22, 1024  ;;  %p437_p1 = scmp.lt.s32.totalorder %s32_s22, %s32_s22 }
   0x6   :  { %p433_p0 = scmp.ne.s32.totalorder %s32_s22, %s432_s23  ;;  %p438_p2 = scmp.lt.s32.totalorder %s432_s23, %s432_s23 }
   0x8   :  { %p439_p3 = por %p438_p2, %p437_p1 }
   0xa   :  { %p440_p4 = pnand %p439_p3, %p433_p0 }
   0xc   :  { %443 = shalt.err (!%p440_p4)
}
   0xd   :  { %s533_s24 = smov 64   ;;  %s534_s25 = smov 4  }
   0xe   :  { %37 = dma.hbm_to_vmem [thread:$0]  %s598_s1, 1024, %s32_s22, [#allocation6], %s533_s24, %s533_s24, %s534_s25  }
   0xf   :  { %s535_s28 = smov [#allocation2]   ;;  %s536_s30 = smov [#allocation7]  }
  0x10   :  { %s22_s29 = sshll.u32 %s535_s28, 4  ;;  %s43_s7 = sshll.u32 %s536_s30, 4  ;;  %s23_s29 = int_to_ptr.vmem [resolvable:$true] %s22_s29  ;;  %s44_s7 = int_to_ptr.vmem [resolvable:$true] %s43_s7 }
  0x11   :  { %s452_s8 = scalar_lea.vmem %s23_s29, 64  ;;  %p457_p6 = scmp.lt.s32.totalorder %s23_s29, %s23_s29 }
  0x12   :  { %p453_p5 = scmp.ne.s32.totalorder %s23_s29, %s452_s8  ;;  %p458_p7 = scmp.lt.s32.totalorder %s452_s8, %s452_s8 }
  0x14   :  { %p459_p8 = por %p458_p7, %p457_p6 }
  0x16   :  { %p460_p9 = pnand %p459_p8, %p453_p5 }
  0x18   :  { %463 = shalt.err (!%p460_p9)
}
  0x19   :  { %25 = dma.hbm_to_vmem [thread:$0]  %s597_s0, 64, %s23_s29, [#allocation3]  }
  0x1a   :  { %s472_s11 = scalar_lea.vmem %s44_s7, 1024  ;;  %p477_p11 = scmp.lt.s32.totalorder %s44_s7, %s44_s7 }
  0x1b   :  { %p473_p10 = scmp.ne.s32.totalorder %s44_s7, %s472_s11  ;;  %p478_p12 = scmp.lt.s32.totalorder %s472_s11, %s472_s11 }
  0x1d   :  { %p479_p13 = por %p478_p12, %p477_p11 }
  0x1f   :  { %p480_p0 = pnand %p479_p13, %p473_p10 }
  0x21   :  { %483 = shalt.err (!%p480_p0)
}
  0x22   :  { %49 = dma.hbm_to_vmem [thread:$0]  %s599_s2, 1024, %s44_s7, [#allocation6], %s533_s24, %s533_s24, %s534_s25  }
  0x23   :  { %524 = dma.done.wait [#allocation3], 64  }
  0x24   :  { %525 = vsyncadd [#allocation3], 4294967232 }
  0x25   :  { %526 = dma.done.wait [#allocation6], 2048  }
  0x26   :  { %527 = vsyncadd [#allocation6], 4294965248  ;;  %v537_v0 = vmov 0.0   ;;  %vm538_vm0 = vmmov 0   ;;  %v406_v1 = vld [vmem:[#allocation5 + $0x38] sm:$0xff]   ;;  %v407_v2 = vld [vmem:[#allocation5 + $0x30] sm:$0xff]  }
  0x27   :  { %357 = vmatprep.subr.bf16.mxu0 %v537_v0  ;;  %373 = vmatprep.mubr.msk.bf16.mxu0 %vm538_vm0, %v537_v0  ;;  %v408_v3 = vld [vmem:[#allocation5 + $0x28] sm:$0xff]   ;;  %v414_v4 = vld [vmem:[#allocation7 + $0x38] sm:$0xff]   ;;  %v409_v5 = vld [vmem:[#allocation5 + $0x20] sm:$0xff]   ;;  %s539_s13 = smov [#allocation8]  }
  0x28   :  { %377 = vmatprep.subr.bf16.mxu1 %v537_v0  ;;  %393 = vmatprep.mubr.msk.bf16.mxu1 %vm538_vm0, %v537_v0  ;;  %v415_v6 = vld [vmem:[#allocation7 + $0x30] sm:$0xff]   ;;  %v410_v7 = vld [vmem:[#allocation5 + $0x18] sm:$0xff]   ;;  %v416_v8 = vld [vmem:[#allocation7 + $0x28] sm:$0xff]   ;;  %s297_s14 = sshll.u32 %s539_s13, 4  ;;  %s298_s14 = int_to_ptr.vmem [resolvable:$true] %s297_s14 }
  0x29   :  { %358 = vmatpush3.bf16.msra.mxu0 %v406_v1  ;;  %378 = vmatpush3.bf16.msra.mxu1 %v414_v4  ;;  %v411_v9 = vld [vmem:[#allocation5 + $0x10] sm:$0xff]   ;;  %v412_v10 = vld [vmem:[#allocation5 + $0x8] sm:$0xff]   ;;  %v413_v11 = vld [vmem:[#allocation5] sm:$0xff]   ;;  %s484_s15 = scalar_lea.vmem %s298_s14, 128  ;;  %p489_p2 = scmp.lt.s32.totalorder %s298_s14, %s298_s14 }
  0x2a   :  { %359 = vmatprep.subr.bf16.mxu0 %v537_v0  ;;  %379 = vmatprep.subr.bf16.mxu1 %v537_v0  ;;  %v64_v12 = vld [vmem:[#allocation2] sm:$0xf]  ;;  %v417_v13 = vld [vmem:[#allocation7 + $0x20] sm:$0xff]   ;;  %v419_v15 = vld [vmem:[#allocation7 + $0x10] sm:$0xff]   ;;  %p485_p1 = scmp.ne.s32.totalorder %s298_s14, %s484_s15  ;;  %p490_p3 = scmp.lt.s32.totalorder %s484_s15, %s484_s15 }
  0x2b   :  { %v418_v14 = vld [vmem:[#allocation7 + $0x18] sm:$0xff]   ;;  %v420_v16 = vld [vmem:[#allocation7 + $0x8] sm:$0xff]   ;;  %v421_v17 = vld [vmem:[#allocation7] sm:$0xff]  }
  0x2c   :  { %v321_v18 = vld [vmem:[%s600_s3] ss:$0 sm:$0xff]  ;;  %p491_p4 = por %p490_p3, %p489_p2 }
  0x2d   :  { %360 = vmatpush3.bf16.msra.mxu0 %v407_v2  ;;  %380 = vmatpush3.bf16.msra.mxu1 %v415_v6 }
  0x2e   :  { %361 = vmatprep.subr.bf16.mxu0 %v537_v0  ;;  %381 = vmatprep.subr.bf16.mxu1 %v537_v0  ;;  %p492_p5 = pnand %p491_p4, %p485_p1 }
  0x31   :  { %362 = vmatpush3.bf16.msra.mxu0 %v408_v3  ;;  %382 = vmatpush3.bf16.msra.mxu1 %v416_v8 }
  0x32   :  { %363 = vmatprep.subr.bf16.mxu0 %v537_v0  ;;  %383 = vmatprep.subr.bf16.mxu1 %v537_v0 }
  0x35   :  { %364 = vmatpush3.bf16.msra.mxu0 %v409_v5  ;;  %384 = vmatpush3.bf16.msra.mxu1 %v417_v13 }
  0x36   :  { %365 = vmatprep.subr.bf16.mxu0 %v537_v0  ;;  %385 = vmatprep.subr.bf16.mxu1 %v537_v0 }
  0x39   :  { %366 = vmatpush3.bf16.msra.mxu0 %v410_v7  ;;  %386 = vmatpush3.bf16.msra.mxu1 %v418_v14 }
  0x3a   :  { %367 = vmatprep.subr.bf16.mxu0 %v537_v0  ;;  %387 = vmatprep.subr.bf16.mxu1 %v537_v0 }
  0x3d   :  { %368 = vmatpush3.bf16.msra.mxu0 %v411_v9  ;;  %388 = vmatpush3.bf16.msra.mxu1 %v419_v15 }
  0x3e   :  { %369 = vmatprep.subr.bf16.mxu0 %v537_v0  ;;  %389 = vmatprep.subr.bf16.mxu1 %v537_v0 }
  0x41   :  { %370 = vmatpush3.bf16.msra.mxu0 %v412_v10  ;;  %390 = vmatpush3.bf16.msra.mxu1 %v420_v16 }
  0x42   :  { %371 = vmatprep.subr.bf16.mxu0 %v537_v0  ;;  %391 = vmatprep.subr.bf16.mxu1 %v537_v0 }
  0x45   :  { %372 = vmatpush3.bf16.msra.mxu0 %v413_v11  ;;  %392 = vmatpush3.bf16.msra.mxu1 %v421_v17 }
  0x48   :  { %374 = vmatmul.mubr.bf16.vlgmr.msra.gmra.mxu0 %v64_v12 }
 0x108   :  { %v170_v19 = vpop.f32.mrf.mxu0 }
 0x109   :  { %v171_v20 = vadd.f32 %v321_v18, %v170_v19 }
 0x10a   :  { %v375_v21 = vpop.f32.mrf.mxu0 }
 0x10b   :  { %422 = vtanh.f32 %v171_v20 }
 0x10c   :  { %v173_v22 = vpop.f32.mrf.mxu0 }
 0x10e   :  { %v376_v23 = vpop.f32.mrf.mxu0 }
 0x118   :  { %v423_v24 = vpop.eup %422 }
 0x119   :  { %177 = vst [vmem:[#allocation8] sm:$0xff] %v423_v24  ;;  %v178_v25 = vpack.c.bf16 %v423_v24, %v423_v24 }
 0x11b   :  { %394 = vmatmul.mubr.bf16.vlgmr.msra.gmra.mxu1 %v178_v25 }
 0x11c   :  { %495 = shalt.err (!%p492_p5)
}
 0x11d   :  { %300 = dma.vmem_to_hbm [thread:$0]  %s298_s14, 128, %s602_s5, [#allocation4]   ;;  %v330_v26 = vld [vmem:[%s601_s4] ss:$0 sm:$0xff] }
 0x11e   :  { %s540_s19 = smov [#allocation9]  }
 0x11f   :  { %s307_s20 = sshll.u32 %s540_s19, 4  ;;  %s308_s20 = int_to_ptr.vmem [resolvable:$true] %s307_s20 }
 0x120   :  { %s504_s21 = scalar_lea.vmem %s308_s20, 128  ;;  %p509_p7 = scmp.lt.s32.totalorder %s308_s20, %s308_s20 }
 0x121   :  { %p505_p6 = scmp.ne.s32.totalorder %s308_s20, %s504_s21  ;;  %p510_p8 = scmp.lt.s32.totalorder %s504_s21, %s504_s21 }
 0x123   :  { %p511_p9 = por %p510_p8, %p509_p7 }
 0x125   :  { %p512_p10 = pnand %p511_p9, %p505_p6 }
 0x1db   :  { %v284_v27 = vpop.f32.mrf.mxu1 }
 0x1dc   :  { %v285_v28 = vadd.f32 %v330_v26, %v284_v27 }
 0x1dd   :  { %v395_v29 = vpop.f32.mrf.mxu1 }
 0x1de   :  { %290 = vst [vmem:[#allocation9] sm:$0xff] %v285_v28 }
 0x1df   :  { %v287_v30 = vpop.f32.mrf.mxu1 }
 0x1e0   :  { %515 = shalt.err (!%p512_p10)
}
 0x1e1   :  { %310 = dma.vmem_to_hbm [thread:$0]  %s308_s20, 128, %s603_s6, [#allocation10]   ;;  %v396_v31 = vpop.f32.mrf.mxu1 }
 0x1e2   :  { %528 = dma.done.wait [#allocation4], 128  }
 0x1e3   :  { %529 = vsyncadd [#allocation4], 4294967168 }
 0x1e4   :  { %530 = dma.done.wait [#allocation10], 128  }
 0x1e5   :  { %531 = vsyncadd [#allocation10], 4294967168 }
 0x1e6   :  { %317 = vsyncpa [#allocation3], 1 }
 0x1e7   :  { %318 = vsyncpa [#allocation6], 1 }
 0x1e8   :  { %319 = vsyncpa [#allocation4], 1 }
 0x1e9   :  { %320 = vsyncpa [#allocation10], 1 }

// kernel: tpu_custom_call.1
= control target key start
LH: loop header
LB: loop body
LE: loop exit
PB: predicated region body
PF: predicated region fallthrough
CT: control target
= control target key end

     0   :  { %12 = vsyncpa [#allocation3], 0  ;;  %s597_s0 = inlined_call_operand.hbm [shape: bf16[8,128], index: 0, kind: input, shape index: {}]   ;;  %s598_s1 = inlined_call_operand.hbm [shape: bf16[128,128], index: 1, kind: input, shape index: {}]   ;;  %s599_s2 = inlined_call_operand.hbm [shape: bf16[128,128], index: 2, kind: input, shape index: {}]   ;;  %s600_s3 = inlined_call_operand.vmem [shape: f32[1,128], index: 3, kind: input, shape index: {}]   ;;  %s601_s4 = inlined_call_operand.vmem [shape: f32[1,128], index: 4, kind: input, shape index: {}]   ;;  %s602_s5 = inlined_call_operand.hbm [shape: f32[8,128], index: 5, kind: output, shape index: {0}]   ;;  %s603_s6 = inlined_call_operand.hbm [shape: f32[8,128], index: 6, kind: output, shape index: {1}]  }
   0x1   :  { %13 = vsyncpa [#allocation6], 0 }
   0x2   :  { %14 = vsyncpa [#allocation4], 0 }
   0x3   :  { %15 = vsyncpa [#allocation10], 0  ;;  %s532_s21 = smov [#allocation5]  }
   0x4   :  { %s31_s22 = sshll.u32 %s532_s21, 4  ;;  %s32_s22 = int_to_ptr.vmem [resolvable:$true] %s31_s22 }
   0x5   :  { %s432_s23 = scalar_lea.vmem %s32_s22, 1024  ;;  %p437_p1 = scmp.lt.s32.totalorder %s32_s22, %s32_s22 }
   0x6   :  { %p433_p0 = scmp.ne.s32.totalorder %s32_s22, %s432_s23  ;;  %p438_p2 = scmp.lt.s32.totalorder %s432_s23, %s432_s23 }
   0x8   :  { %p439_p3 = por %p438_p2, %p437_p1 }
   0xa   :  { %p440_p4 = pnand %p439_p3, %p433_p0 }
   0xc   :  { %443 = shalt.err (!%p440_p4)
}
   0xd   :  { %s533_s24 = smov 64   ;;  %s534_s25 = smov 4  }
   0xe   :  { %37 = dma.hbm_to_vmem [thread:$0]  %s598_s1, 1024, %s32_s22, [#allocation6], %s533_s24, %s533_s24, %s534_s25  }
   0xf   :  { %s535_s28 = smov [#allocation2]   ;;  %s536_s30 = smov [#allocation7]  }
  0x10   :  { %s22_s29 = sshll.u32 %s535_s28, 4  ;;  %s43_s7 = sshll.u32 %s536_s30, 4  ;;  %s23_s29 = int_to_ptr.vmem [resolvable:$true] %s22_s29  ;;  %s44_s7 = int_to_ptr.vmem [resolvable:$true] %s43_s7 }
  0x11   :  { %s452_s8 = scalar_lea.vmem %s23_s29, 64  ;;  %p457_p6 = scmp.lt.s32.totalorder %s23_s29, %s23_s29 }
  0x12   :  { %p453_p5 = scmp.ne.s32.totalorder %s23_s29, %s452_s8  ;;  %p458_p7 = scmp.lt.s32.totalorder %s452_s8, %s452_s8 }
  0x14   :  { %p459_p8 = por %p458_p7, %p457_p6 }
  0x16   :  { %p460_p9 = pnand %p459_p8, %p453_p5 }
  0x18   :  { %463 = shalt.err (!%p460_p9)
}
  0x19   :  { %25 = dma.hbm_to_vmem [thread:$0]  %s597_s0, 64, %s23_s29, [#allocation3]  }
  0x1a   :  { %s472_s11 = scalar_lea.vmem %s44_s7, 1024  ;;  %p477_p11 = scmp.lt.s32.totalorder %s44_s7, %s44_s7 }
  0x1b   :  { %p473_p10 = scmp.ne.s32.totalorder %s44_s7, %s472_s11  ;;  %p478_p12 = scmp.lt.s32.totalorder %s472_s11, %s472_s11 }
  0x1d   :  { %p479_p13 = por %p478_p12, %p477_p11 }
  0x1f   :  { %p480_p0 = pnand %p479_p13, %p473_p10 }
  0x21   :  { %483 = shalt.err (!%p480_p0)
}
  0x22   :  { %49 = dma.hbm_to_vmem [thread:$0]  %s599_s2, 1024, %s44_s7, [#allocation6], %s533_s24, %s533_s24, %s534_s25  }
  0x23   :  { %524 = dma.done.wait [#allocation3], 64  }
  0x24   :  { %525 = vsyncadd [#allocation3], 4294967232 }
  0x25   :  { %526 = dma.done.wait [#allocation6], 2048  }
  0x26   :  { %527 = vsyncadd [#allocation6], 4294965248  ;;  %v537_v0 = vmov 0.0   ;;  %vm538_vm0 = vmmov 0   ;;  %v406_v1 = vld [vmem:[#allocation5 + $0x38] sm:$0xff]   ;;  %v407_v2 = vld [vmem:[#allocation5 + $0x30] sm:$0xff]  }
  0x27   :  { %357 = vmatprep.subr.bf16.mxu0 %v537_v0  ;;  %373 = vmatprep.mubr.msk.bf16.mxu0 %vm538_vm0, %v537_v0  ;;  %v408_v3 = vld [vmem:[#allocation5 + $0x28] sm:$0xff]   ;;  %v414_v4 = vld [vmem:[#allocation7 + $0x38] sm:$0xff]   ;;  %v409_v5 = vld [vmem:[#allocation5 + $0x20] sm:$0xff]   ;;  %s539_s13 = smov [#allocation8]  }
  0x28   :  { %377 = vmatprep.subr.bf16.mxu1 %v537_v0  ;;  %393 = vmatprep.mubr.msk.bf16.mxu1 %vm538_vm0, %v537_v0  ;;  %v415_v6 = vld [vmem:[#allocation7 + $0x30] sm:$0xff]   ;;  %v410_v7 = vld [vmem:[#allocation5 + $0x18] sm:$0xff]   ;;  %v416_v8 = vld [vmem:[#allocation7 + $0x28] sm:$0xff]   ;;  %s297_s14 = sshll.u32 %s539_s13, 4  ;;  %s298_s14 = int_to_ptr.vmem [resolvable:$true] %s297_s14 }
  0x29   :  { %358 = vmatpush3.bf16.msra.mxu0 %v406_v1  ;;  %378 = vmatpush3.bf16.msra.mxu1 %v414_v4  ;;  %v411_v9 = vld [vmem:[#allocation5 + $0x10] sm:$0xff]   ;;  %v412_v10 = vld [vmem:[#allocation5 + $0x8] sm:$0xff]   ;;  %v413_v11 = vld [vmem:[#allocation5] sm:$0xff]   ;;  %s484_s15 = scalar_lea.vmem %s298_s14, 128  ;;  %p489_p2 = scmp.lt.s32.totalorder %s298_s14, %s298_s14 }
  0x2a   :  { %359 = vmatprep.subr.bf16.mxu0 %v537_v0  ;;  %379 = vmatprep.subr.bf16.mxu1 %v537_v0  ;;  %v64_v12 = vld [vmem:[#allocation2] sm:$0xf]  ;;  %v417_v13 = vld [vmem:[#allocation7 + $0x20] sm:$0xff]   ;;  %v419_v15 = vld [vmem:[#allocation7 + $0x10] sm:$0xff]   ;;  %p485_p1 = scmp.ne.s32.totalorder %s298_s14, %s484_s15  ;;  %p490_p3 = scmp.lt.s32.totalorder %s484_s15, %s484_s15 }
  0x2b   :  { %v418_v14 = vld [vmem:[#allocation7 + $0x18] sm:$0xff]   ;;  %v420_v16 = vld [vmem:[#allocation7 + $0x8] sm:$0xff]   ;;  %v421_v17 = vld [vmem:[#allocation7] sm:$0xff]  }
  0x2c   :  { %v321_v18 = vld [vmem:[%s600_s3] ss:$0 sm:$0xff]  ;;  %p491_p4 = por %p490_p3, %p489_p2 }
  0x2d   :  { %360 = vmatpush3.bf16.msra.mxu0 %v407_v2  ;;  %380 = vmatpush3.bf16.msra.mxu1 %v415_v6 }
  0x2e   :  { %361 = vmatprep.subr.bf16.mxu0 %v537_v0  ;;  %381 = vmatprep.subr.bf16.mxu1 %v537_v0  ;;  %p492_p5 = pnand %p491_p4, %p485_p1 }
  0x31   :  { %362 = vmatpush3.bf16.msra.mxu0 %v408_v3  ;;  %382 = vmatpush3.bf16.msra.mxu1 %v416_v8 }
  0x32   :  { %363 = vmatprep.subr.bf16.mxu0 %v537_v0  ;;  %383 = vmatprep.subr.bf16.mxu1 %v537_v0 }
  0x35   :  { %364 = vmatpush3.bf16.msra.mxu0 %v409_v5  ;;  %384 = vmatpush3.bf16.msra.mxu1 %v417_v13 }
  0x36   :  { %365 = vmatprep.subr.bf16.mxu0 %v537_v0  ;;  %385 = vmatprep.subr.bf16.mxu1 %v537_v0 }
  0x39   :  { %366 = vmatpush3.bf16.msra.mxu0 %v410_v7  ;;  %386 = vmatpush3.bf16.msra.mxu1 %v418_v14 }
  0x3a   :  { %367 = vmatprep.subr.bf16.mxu0 %v537_v0  ;;  %387 = vmatprep.subr.bf16.mxu1 %v537_v0 }
  0x3d   :  { %368 = vmatpush3.bf16.msra.mxu0 %v411_v9  ;;  %388 = vmatpush3.bf16.msra.mxu1 %v419_v15 }
  0x3e   :  { %369 = vmatprep.subr.bf16.mxu0 %v537_v0  ;;  %389 = vmatprep.subr.bf16.mxu1 %v537_v0 }
  0x41   :  { %370 = vmatpush3.bf16.msra.mxu0 %v412_v10  ;;  %390 = vmatpush3.bf16.msra.mxu1 %v420_v16 }
  0x42   :  { %371 = vmatprep.subr.bf16.mxu0 %v537_v0  ;;  %391 = vmatprep.subr.bf16.mxu1 %v537_v0 }
  0x45   :  { %372 = vmatpush3.bf16.msra.mxu0 %v413_v11  ;;  %392 = vmatpush3.bf16.msra.mxu1 %v421_v17 }
  0x48   :  { %374 = vmatmul.mubr.bf16.vlgmr.msra.gmra.mxu0 %v64_v12 }
 0x108   :  { %v170_v19 = vpop.f32.mrf.mxu0 }
 0x109   :  { %v171_v20 = vadd.f32 %v321_v18, %v170_v19 }
 0x10a   :  { %v375_v21 = vpop.f32.mrf.mxu0 }
 0x10b   :  { %422 = vtanh.f32 %v171_v20 }
 0x10c   :  { %v173_v22 = vpop.f32.mrf.mxu0 }
 0x10e   :  { %v376_v23 = vpop.f32.mrf.mxu0 }
 0x118   :  { %v423_v24 = vpop.eup %422 }
 0x119   :  { %177 = vst [vmem:[#allocation8] sm:$0xff] %v423_v24  ;;  %v178_v25 = vpack.c.bf16 %v423_v24, %v423_v24 }
 0x11b   :  { %394 = vmatmul.mubr.bf16.vlgmr.msra.gmra.mxu1 %v178_v25 }
 0x11c   :  { %495 = shalt.err (!%p492_p5)
}
 0x11d   :  { %300 = dma.vmem_to_hbm [thread:$0]  %s298_s14, 128, %s602_s5, [#allocation4]   ;;  %v330_v26 = vld [vmem:[%s601_s4] ss:$0 sm:$0xff] }
 0x11e   :  { %s540_s19 = smov [#allocation9]  }
 0x11f   :  { %s307_s20 = sshll.u32 %s540_s19, 4  ;;  %s308_s20 = int_to_ptr.vmem [resolvable:$true] %s307_s20 }
 0x120   :  { %s504_s21 = scalar_lea.vmem %s308_s20, 128  ;;  %p509_p7 = scmp.lt.s32.totalorder %s308_s20, %s308_s20 }
 0x121   :  { %p505_p6 = scmp.ne.s32.totalorder %s308_s20, %s504_s21  ;;  %p510_p8 = scmp.lt.s32.totalorder %s504_s21, %s504_s21 }
 0x123   :  { %p511_p9 = por %p510_p8, %p509_p7 }
 0x125   :  { %p512_p10 = pnand %p511_p9, %p505_p6 }
 0x1db   :  { %v284_v27 = vpop.f32.mrf.mxu1 }
 0x1dc   :  { %v285_v28 = vadd.f32 %v330_v26, %v284_v27 }
 0x1dd   :  { %v395_v29 = vpop.f32.mrf.mxu1 }
 0x1de   :  { %290 = vst [vmem:[#allocation9] sm:$0xff] %v285_v28 }
 0x1df   :  { %v287_v30 = vpop.f32.mrf.mxu1 }
 0x1e0   :  { %515 = shalt.err (!%p512_p10)
}
 0x1e1   :  { %310 = dma.vmem_to_hbm [thread:$0]  %s308_s20, 128, %s603_s6, [#allocation10]   ;;  %v396_v31 = vpop.f32.mrf.mxu1 }
 0x1e2   :  { %528 = dma.done.wait [#allocation4], 128  }
 0x1e3   :  { %529 = vsyncadd [#allocation4], 4294967168 }
 0x1e4   :  { %530 = dma.done.wait [#allocation10], 128  }
 0x1e5   :  { %531 = vsyncadd [#allocation10], 4294967168 }
 0x1e6   :  { %317 = vsyncpa [#allocation3], 1 }
 0x1e7   :  { %318 = vsyncpa [#allocation6], 1 }
 0x1e8   :  { %319 = vsyncpa [#allocation4], 1 }
 0x1e9   :  { %320 = vsyncpa [#allocation10], 1 }

</bundles_post_ra>
